<compile_context>
chip_gen: v7x
topology: tpu7x:2x2x1
jax: 0.10.0
libtpu: 0.0.40
codegen_flags: <defaults>
</compile_context>

<pallas_src>
import functools

import jax
import jax.numpy as jnp
from jax.experimental import pallas as pl
from jax.experimental.pallas import tpu as pltpu


# ----------------------------- helpers -----------------------------

_ROW_TILE = 256        # rows per block for fused row-wise kernels
_MLP_ROW_TILE = 256    # rows per block for the fused MLP kernel
_VMEM_LIMIT = 48 * 1024 * 1024   # scoped VMEM limit for the heavy kernels


def _round_up(x, m):
    return ((x + m - 1) // m) * m


def _row_tiles(M, target):
    """Fixed 8-aligned row tile; caller pads M up to a tile multiple."""
    tm = min(target, _round_up(M, 8))
    return tm, _round_up(M, tm)


def _pad_rows(x, Mp):
    M = x.shape[0]
    if Mp == M:
        return x
    return jnp.pad(x, ((0, Mp - M),) + ((0, 0),) * (x.ndim - 1))


def _ln_f32(x, g, b):
    x = x.astype(jnp.float32)
    mu = jnp.mean(x, axis=-1, keepdims=True)
    var = jnp.mean(jnp.square(x - mu), axis=-1, keepdims=True)
    return (x - mu) * jax.lax.rsqrt(var + 1e-5) * g + b


def _cparams(sem):
    return pltpu.CompilerParams(dimension_semantics=sem,
                                vmem_limit_bytes=_VMEM_LIMIT)


# --- single-buffered specs for grid-invariant operands (weights / biases) ---

_BUFFERED_SUPPORT = None


def _probe_kernel(x_ref, o_ref):
    o_ref[...] = x_ref[...]


def _buffered_one_supported():
    """Probe once whether pipeline_mode=pl.Buffered(1) compiles & runs."""
    global _BUFFERED_SUPPORT
    if _BUFFERED_SUPPORT is not None:
        return _BUFFERED_SUPPORT
    try:
        spec = pl.BlockSpec((8, 128), lambda i: (0, 0),
                            pipeline_mode=pl.Buffered(1))
        out = pl.pallas_call(
            _probe_kernel,
            grid=(1,),
            in_specs=[spec],
            out_specs=pl.BlockSpec((8, 128), lambda i: (0, 0)),
            out_shape=jax.ShapeDtypeStruct((8, 128), jnp.float32),
        )(jnp.zeros((8, 128), jnp.float32))
        jax.block_until_ready(out)
        _BUFFERED_SUPPORT = True
    except Exception:  # noqa: BLE001 - fall back on any older-JAX failure
        _BUFFERED_SUPPORT = False
    return _BUFFERED_SUPPORT


def _const_spec(block_shape):
    """BlockSpec for operands whose block never changes across the grid."""
    zeros = tuple(0 for _ in block_shape)
    idx = lambda i: zeros  # all users have a single grid axis
    if _buffered_one_supported():
        return pl.BlockSpec(block_shape, idx, pipeline_mode=pl.Buffered(1))
    return pl.BlockSpec(block_shape, idx)


# ----------------------------- Pallas kernels -----------------------------

def _matmul_acc_kernel(x_ref, w_ref, o_ref, acc_ref):
    """Tiled matmul (bf16 operands) with f32 VMEM accumulator over K."""
    @pl.when(pl.program_id(2) == 0)
    def _():
        acc_ref[...] = jnp.zeros_like(acc_ref)

    acc_ref[...] += jnp.dot(x_ref[...], w_ref[...],
                            preferred_element_type=jnp.float32)

    @pl.when(pl.program_id(2) == pl.num_programs(2) - 1)
    def _():
        o_ref[...] = acc_ref[...].astype(o_ref.dtype)


def _layernorm_kernel(x_ref, g_ref, b_ref, o_ref):
    o_ref[...] = _ln_f32(x_ref[...], g_ref[...], b_ref[...]).astype(o_ref.dtype)


def _ln_linear_kernel(x_ref, g_ref, b_ref, w_ref, wb_ref, o_ref):
    """LayerNorm fused into the following linear projection (ln1 + QKV)."""
    xn = _ln_f32(x_ref[...], g_ref[...], b_ref[...])
    y = jnp.dot(xn.astype(jnp.bfloat16), w_ref[...],
                preferred_element_type=jnp.float32) + wb_ref[...]
    o_ref[...] = y.astype(o_ref.dtype)


def _ln_matmul_kernel(x_ref, g_ref, b_ref, w_ref, o_ref):
    """LayerNorm fused into a bias-free projection (ln_post+proj / ln_final+proj)."""
    xn = _ln_f32(x_ref[...], g_ref[...], b_ref[...])
    o_ref[...] = jnp.dot(xn.astype(jnp.bfloat16), w_ref[...],
                         preferred_element_type=jnp.float32).astype(o_ref.dtype)


def _ln_mlp_residual_kernel(x_ref, g_ref, b_ref, w1_ref, b1_ref,
                            w2_ref, b2_ref, o_ref):
    """ln2 + fc1 + QuickGELU + fc2 + residual; 4D hidden never leaves VMEM."""
    x = x_ref[...]
    xn = _ln_f32(x, g_ref[...], b_ref[...])
    h = jnp.dot(xn.astype(jnp.bfloat16), w1_ref[...],
                preferred_element_type=jnp.float32) + b1_ref[...]
    # QuickGELU in bf16 (bf16 VPU/EUP on v6e/v7x; still correct on v5e).
    hb = h.astype(jnp.bfloat16)
    act = hb * jax.nn.sigmoid(1.702 * hb)
    y = jnp.dot(act, w2_ref[...], preferred_element_type=jnp.float32) + b2_ref[...]
    o_ref[...] = (x.astype(jnp.float32) + y).astype(o_ref.dtype)


def _mha_outproj_kernel(qkv_ref, wo_ref, bo_ref, res_ref, o_ref, *,
                        heads, dh, causal):
    """All heads of one batch element + fused out-projection + residual.

    Attention scale is pre-folded into the Q weights.  Each head's result is
    immediately contracted with its slice of W_out and accumulated, so no
    per-head concatenate and no separate out-projection kernel.
    """
    qkv = qkv_ref[0]                                   # (S, 3D) bf16
    S = qkv.shape[0]
    D = heads * dh
    if causal:
        row = jax.lax.broadcasted_iota(jnp.int32, (S, S), 0)
        col = jax.lax.broadcasted_iota(jnp.int32, (S, S), 1)
        keep = col <= row
    acc = jnp.zeros((S, D), jnp.float32)
    for h in range(heads):                             # static unroll over heads
        q = qkv[:, h * dh:(h + 1) * dh]
        k = qkv[:, D + h * dh:D + (h + 1) * dh]
        v = qkv[:, 2 * D + h * dh:2 * D + (h + 1) * dh]
        # contract last dims directly (no explicit k.T transpose)
        s = jax.lax.dot_general(q, k, (((1,), (1,)), ((), ())),
                                preferred_element_type=jnp.float32)
        if causal:
            s = jnp.where(keep, s, -1e9)
        m = jnp.max(s, axis=-1, keepdims=True)
        p = jnp.exp(s - m)
        p = p * pl.reciprocal(jnp.sum(p, axis=-1, keepdims=True), approx=True)
        head = jnp.dot(p.astype(jnp.bfloat16), v,
                       preferred_element_type=jnp.float32)
        acc = acc + jnp.dot(head.astype(jnp.bfloat16),
                            wo_ref[h * dh:(h + 1) * dh, :],
                            preferred_element_type=jnp.float32)
    out = acc + bo_ref[...] + res_ref[0].astype(jnp.float32)
    o_ref[0] = out.astype(o_ref.dtype)


# ----------------------------- kernel wrappers -----------------------------

def pallas_matmul_tiled(x, w, out_dtype=jnp.bfloat16, tm=256, tn=256, tk=512):
    """x: (M, K) bf16, w: (K, N) bf16 -> (M, N) out_dtype.  Pads to tiles."""
    M, K = x.shape
    N = w.shape[1]
    tm = min(tm, _round_up(M, 8))
    tn = min(tn, _round_up(N, 128))
    tk = min(tk, _round_up(K, 128))
    Mp, Np, Kp = _round_up(M, tm), _round_up(N, tn), _round_up(K, tk)
    if Mp != M or Kp != K:
        x = jnp.pad(x, ((0, Mp - M), (0, Kp - K)))
    if Kp != K or Np != N:
        w = jnp.pad(w, ((0, Kp - K), (0, Np - N)))
    out = pl.pallas_call(
        _matmul_acc_kernel,
        grid=(Mp // tm, Np // tn, Kp // tk),
        in_specs=[pl.BlockSpec((tm, tk), lambda i, j, k: (i, k)),
                  pl.BlockSpec((tk, tn), lambda i, j, k: (k, j))],
        out_specs=pl.BlockSpec((tm, tn), lambda i, j, k: (i, j)),
        out_shape=jax.ShapeDtypeStruct((Mp, Np), out_dtype),
        scratch_shapes=[pltpu.VMEM((tm, tn), jnp.float32)],
        compiler_params=_cparams(("parallel", "parallel", "arbitrary")),
    )(x, w)
    if Mp != M or Np != N:
        out = out[:M, :N]
    return out


def pallas_layernorm(x, g, b, tm=_ROW_TILE):
    M, D = x.shape
    tm, Mp = _row_tiles(M, tm)
    out = pl.pallas_call(
        _layernorm_kernel,
        grid=(Mp // tm,),
        in_specs=[pl.BlockSpec((tm, D), lambda i: (i, 0)),
                  _const_spec((1, D)),
                  _const_spec((1, D))],
        out_specs=pl.BlockSpec((tm, D), lambda i: (i, 0)),
        out_shape=jax.ShapeDtypeStruct((Mp, D), jnp.bfloat16),
        compiler_params=_cparams(("parallel",)),
    )(_pad_rows(x, Mp), g.reshape(1, D), b.reshape(1, D))
    return out[:M] if Mp != M else out


def pallas_ln_linear(x, g, b, w, wb, tm=_ROW_TILE):
    M, D = x.shape
    N = w.shape[1]
    tm, Mp = _row_tiles(M, tm)
    out = pl.pallas_call(
        _ln_linear_kernel,
        grid=(Mp // tm,),
        in_specs=[pl.BlockSpec((tm, D), lambda i: (i, 0)),
                  _const_spec((1, D)),
                  _const_spec((1, D)),
                  _const_spec((D, N)),
                  _const_spec((1, N))],
        out_specs=pl.BlockSpec((tm, N), lambda i: (i, 0)),
        out_shape=jax.ShapeDtypeStruct((Mp, N), jnp.bfloat16),
        compiler_params=_cparams(("parallel",)),
    )(_pad_rows(x, Mp), g.reshape(1, D), b.reshape(1, D), w, wb.reshape(1, N))
    return out[:M] if Mp != M else out


def pallas_ln_matmul(x, g, b, w, tm=_ROW_TILE):
    """Tail fusion (ln_post+proj / ln_final+text_proj); emits f32 features."""
    M, D = x.shape
    N = w.shape[1]
    tm, Mp = _row_tiles(M, tm)
    out = pl.pallas_call(
        _ln_matmul_kernel,
        grid=(Mp // tm,),
        in_specs=[pl.BlockSpec((tm, D), lambda i: (i, 0)),
                  _const_spec((1, D)),
                  _const_spec((1, D)),
                  _const_spec((D, N))],
        out_specs=pl.BlockSpec((tm, N), lambda i: (i, 0)),
        out_shape=jax.ShapeDtypeStruct((Mp, N), jnp.float32),
        compiler_params=_cparams(("parallel",)),
    )(_pad_rows(x, Mp), g.reshape(1, D), b.reshape(1, D), w)
    return out[:M] if Mp != M else out


def pallas_ln_mlp_residual(x, g, b, w1, b1, w2, b2, tm=_MLP_ROW_TILE):
    M, D = x.shape
    Dh = w1.shape[1]
    tm, Mp = _row_tiles(M, tm)
    out = pl.pallas_call(
        _ln_mlp_residual_kernel,
        grid=(Mp // tm,),
        in_specs=[pl.BlockSpec((tm, D), lambda i: (i, 0)),
                  _const_spec((1, D)),
                  _const_spec((1, D)),
                  _const_spec((D, Dh)),
                  _const_spec((1, Dh)),
                  _const_spec((Dh, D)),
                  _const_spec((1, D))],
        out_specs=pl.BlockSpec((tm, D), lambda i: (i, 0)),
        out_shape=jax.ShapeDtypeStruct((Mp, D), jnp.bfloat16),
        compiler_params=_cparams(("parallel",)),
    )(_pad_rows(x, Mp), g.reshape(1, D), b.reshape(1, D),
      w1, b1.reshape(1, Dh), w2, b2.reshape(1, D))
    return out[:M] if Mp != M else out


def pallas_mha_outproj(qkv, w_out, b_out, residual, heads, dh, causal):
    """qkv: (B, S, 3D) bf16, residual: (B, S, D) bf16 -> (B, S, D) bf16."""
    B, S, D3 = qkv.shape
    D = heads * dh
    kern = functools.partial(_mha_outproj_kernel, heads=heads, dh=dh,
                             causal=causal)
    return pl.pallas_call(
        kern,
        grid=(B,),
        in_specs=[pl.BlockSpec((1, S, D3), lambda bi: (bi, 0, 0)),
                  _const_spec((D, D)),
                  _const_spec((1, D)),
                  pl.BlockSpec((1, S, D), lambda bi: (bi, 0, 0))],
        out_specs=pl.BlockSpec((1, S, D), lambda bi: (bi, 0, 0)),
        out_shape=jax.ShapeDtypeStruct((B, S, D), jnp.bfloat16),
        compiler_params=_cparams(("parallel",)),
    )(qkv, w_out, b_out.reshape(1, D), residual)


# ----------------------------- model pieces -----------------------------

def resblock(x2d, p, B, S, causal):
    """CLIP ResidualAttentionBlock (pre-LN), fused kernels. x2d: (B*S, D) bf16."""
    D = x2d.shape[1]
    H = p["heads"]
    Dh = D // H
    # fused ln1 + QKV projection (attention scale is pre-folded into Q weights)
    qkv = pallas_ln_linear(x2d, p["ln1_g"], p["ln1_b"],
                           p["attn_in_w"], p["attn_in_b"])            # (B*S,3D)
    # all heads + out-projection + residual in one kernel per batch element
    x2d = pallas_mha_outproj(qkv.reshape(B, S, 3 * D),
                             p["attn_out_w"], p["attn_out_b"],
                             x2d.reshape(B, S, D),
                             H, Dh, causal).reshape(B * S, D)
    # fused ln2 + fc1 + QuickGELU + fc2 + residual
    x2d = pallas_ln_mlp_residual(x2d, p["ln2_g"], p["ln2_b"],
                                 p["fc1_w"], p["fc1_b"],
                                 p["fc2_w"], p["fc2_b"])
    return x2d


def text_encoder(prompts, tokenized_prompts, tp):
    """TextEncoder.forward: prompts (N, S, D) f32, tokenized (N, S) int32."""
    N, S, D = prompts.shape
    x = (prompts + tp["pos_embed"][None]).astype(jnp.bfloat16)        # wrapper cast
    x = x.reshape(N * S, D)
    for layer in tp["layers"]:
        x = resblock(x, layer, N, S, causal=True)
    x = x.reshape(N, S, D)
    eot = jnp.argmax(tokenized_prompts, axis=-1)          # EOT token position
    x_eot = x[jnp.arange(N), eot]                         # (N, D) tiny gather
    # ln_final fused with text_projection (LN is per-row, so gather-then-LN is
    # equivalent to the reference's LN-then-gather for the returned rows)
    return pallas_ln_matmul(x_eot, tp["ln_final_g"], tp["ln_final_b"],
                            tp["text_projection"])        # (N, embed_dim) f32


def image_encoder(image, vp):
    """CLIP VisionTransformer.  image layout: NCHW (B, C, H, W)."""
    B, C, H, W = image.shape
    P = vp["patch"]
    gh, gw = H // P, W // P
    Dv = vp["width"]
    # unfold non-overlapping patches (== Conv2d stride=kernel=P as a matmul);
    # cast to bf16 in the wrapper so the kernel DMAs half the bytes.
    patches = image.reshape(B, C, gh, P, gw, P).transpose(0, 2, 4, 1, 3, 5)
    patches = patches.reshape(B * gh * gw, C * P * P).astype(jnp.bfloat16)
    x = pallas_matmul_tiled(patches, vp["conv_w"]).reshape(B, gh * gw, Dv)
    cls = jnp.broadcast_to(vp["class_embedding"].reshape(1, 1, Dv), (B, 1, Dv))
    x = jnp.concatenate([cls, x.astype(jnp.float32)], axis=1) + vp["pos_embed"][None]
    x = x.astype(jnp.bfloat16)                                         # (B,S,Dv)
    S = x.shape[1]
    x2d = pallas_layernorm(x.reshape(B * S, Dv), vp["ln_pre_g"], vp["ln_pre_b"])
    for layer in vp["layers"]:
        x2d = resblock(x2d, layer, B, S, causal=False)    # no mask for vision
    cls_tok = x2d.reshape(B, S, Dv)[:, 0, :]              # (B, Dv)
    # ln_post fused with the final projection
    return pallas_ln_matmul(cls_tok, vp["ln_post_g"], vp["ln_post_b"],
                            vp["proj"])                   # (B, embed_dim) f32


def prompt_learner_forward(image, params):
    """PromptLearner.forward(image) -> (image_features, text_features)."""
    image_features = image_encoder(image, params["visual"])
    text_features = text_encoder(params["clip_prompt"],
                                 params["clip_tokenized_prompt"],
                                 params["text"])
    return image_features, text_features


# ----------------------------- param init -----------------------------

def init_resblock(key, d, heads, scale=0.02):
    ks = jax.random.split(key, 4)
    bf = jnp.bfloat16
    dh = d // heads
    # Fold the attention scale dh**-0.5 into the Q third of the QKV projection
    # so the MHA kernel never scales the (S, S) score matrix.
    attn_in_w = scale * jax.random.normal(ks[0], (d, 3 * d), jnp.float32)
    attn_in_b = jnp.zeros((3 * d,), jnp.float32)
    qscale = dh ** -0.5
    attn_in_w = attn_in_w.at[:, :d].multiply(qscale)
    attn_in_b = attn_in_b.at[:d].multiply(qscale)
    return dict(
        heads=heads,
        ln1_g=jnp.ones((d,), jnp.float32), ln1_b=jnp.zeros((d,), jnp.float32),
        attn_in_w=attn_in_w.astype(bf),
        attn_in_b=attn_in_b,
        attn_out_w=(scale * jax.random.normal(ks[1], (d, d), jnp.float32)).astype(bf),
        attn_out_b=jnp.zeros((d,), jnp.float32),
        ln2_g=jnp.ones((d,), jnp.float32), ln2_b=jnp.zeros((d,), jnp.float32),
        fc1_w=(scale * jax.random.normal(ks[2], (d, 4 * d), jnp.float32)).astype(bf),
        fc1_b=jnp.zeros((4 * d,), jnp.float32),
        fc2_w=(scale * jax.random.normal(ks[3], (4 * d, d), jnp.float32)).astype(bf),
        fc2_b=jnp.zeros((d,), jnp.float32),
    )


def build_params(key, *, n_cls, ctx_len, d_txt, d_vis, embed_dim,
                 layers, heads, img_size, patch, channels):
    keys = jax.random.split(key, 16)
    n_patches = (img_size // patch) ** 2
    s_vis = n_patches + 1
    bf = jnp.bfloat16

    text = dict(
        pos_embed=0.01 * jax.random.normal(keys[0], (ctx_len, d_txt), jnp.float32),
        layers=[init_resblock(keys[1 + i], d_txt, heads) for i in range(layers)],
        ln_final_g=jnp.ones((d_txt,), jnp.float32),
        ln_final_b=jnp.zeros((d_txt,), jnp.float32),
        text_projection=(0.02 * jax.random.normal(keys[5], (d_txt, embed_dim),
                                                  jnp.float32)).astype(bf),
    )
    visual = dict(
        patch=patch, width=d_vis,
        conv_w=(0.02 * jax.random.normal(keys[6], (channels * patch * patch, d_vis),
                                         jnp.float32)).astype(bf),
        class_embedding=0.02 * jax.random.normal(keys[7], (d_vis,), jnp.float32),
        pos_embed=0.01 * jax.random.normal(keys[8], (s_vis, d_vis), jnp.float32),
        ln_pre_g=jnp.ones((d_vis,), jnp.float32),
        ln_pre_b=jnp.zeros((d_vis,), jnp.float32),
        layers=[init_resblock(keys[9 + i], d_vis, heads) for i in range(layers)],
        ln_post_g=jnp.ones((d_vis,), jnp.float32),
        ln_post_b=jnp.zeros((d_vis,), jnp.float32),
        proj=(0.02 * jax.random.normal(keys[13], (d_vis, embed_dim),
                                       jnp.float32)).astype(bf),
    )

    # buffers computed in PromptLearner.__init__:
    #   clip_prompt           = token_embedding(tokenized prompts)   (n_cls, ctx, d_txt)
    #   clip_tokenized_prompt = tokenized prompts (ints; argmax -> EOT position)
    clip_prompt = 0.02 * jax.random.normal(keys[14], (n_cls, ctx_len, d_txt), jnp.float32)
    tok = jnp.zeros((n_cls, ctx_len), jnp.int32)
    tok = tok.at[:, 0].set(49406)                 # SOT
    tok = tok.at[:, 1:4].set(
        jax.random.randint(keys[15], (n_cls, 3), 1, 30000, jnp.int32))
    tok = tok.at[:, 4].set(49407)                 # EOT (max token -> argmax hits it)

    return dict(visual=visual, text=text,
                clip_prompt=clip_prompt, clip_tokenized_prompt=tok)


# ----------------------------- main -----------------------------

if __name__ == "__main__":
    B, C, HW = 2, 3, 16
    cfg = dict(n_cls=4, ctx_len=8, d_txt=32, d_vis=32, embed_dim=32,
               layers=2, heads=4, img_size=HW, patch=8, channels=C)

    root = jax.random.PRNGKey(0)
    k_param, k_img = jax.random.split(root)
    params = build_params(k_param, **cfg)
    image = jax.random.normal(k_img, (B, C, HW, HW), jnp.float32)   # NCHW

    image_features, text_features = prompt_learner_forward(image, params)
    jax.block_until_ready((image_features, text_features))

    assert image_features.shape == (B, cfg["embed_dim"])
    assert text_features.shape == (cfg["n_cls"], cfg["embed_dim"])
    assert jnp.all(jnp.isfinite(image_features)) and jnp.all(jnp.isfinite(text_features))
    print("KERNEL_OK")
</pallas_src>

<mosaic_0001>
module attributes {stable_mosaic.version = 11 : i64} {
  func.func @_matmul_acc_kernel(%arg0: i32, %arg1: i32, %arg2: i32, %arg3: memref<8x256xbf16, #tpu.memory_space<vmem>>, %arg4: memref<256x128xbf16, #tpu.memory_space<vmem>>, %arg5: memref<8x128xbf16, #tpu.memory_space<vmem>>, %arg6: memref<8x128xf32, #tpu.memory_space<vmem>>) attributes {dimension_semantics = [#tpu.dimension_semantics<parallel>, #tpu.dimension_semantics<parallel>, #tpu.dimension_semantics<arbitrary>], iteration_bounds = array<i64: 1, 1, 1>, scalar_prefetch = 0 : i64, scratch_operands = 1 : i64, tpu.core_type = #tpu.core_type<tc>, window_params = [{transform_indices = @transform_0, window_bounds = array<i64: 8, 256>}, {transform_indices = @transform_1, window_bounds = array<i64: 256, 128>}, {transform_indices = @transform_2, window_bounds = array<i64: 8, 128>}]} {
    %c0_i32 = arith.constant 0 : i32
    %0 = arith.cmpi eq, %arg2, %c0_i32 : i32
    %1 = arith.extui %0 : i1 to i32
    %c0_i32_0 = arith.constant 0 : i32
    %2 = arith.cmpi ne, %1, %c0_i32_0 : i32
    scf.if %2 {
      %cst_10 = arith.constant 0.000000e+00 : f32
      %12 = vector.broadcast %cst_10 : f32 to vector<8x128xf32>
      %c0_11 = arith.constant 0 : index
      %c0_12 = arith.constant 0 : index
      %13 = vector.load %arg6[%c0_11, %c0_12] : memref<8x128xf32, #tpu.memory_space<vmem>>, vector<8x128xf32>
      tpu.vector_store %arg6[%c0_11, %c0_12], %12 {strides = array<i32>} : memref<8x128xf32, #tpu.memory_space<vmem>>, vector<8x128xf32>,
    } else {
    }
    %c0 = arith.constant 0 : index
    %c0_1 = arith.constant 0 : index
    %3 = vector.load %arg6[%c0, %c0_1] : memref<8x128xf32, #tpu.memory_space<vmem>>, vector<8x128xf32>
    %c0_2 = arith.constant 0 : index
    %c0_3 = arith.constant 0 : index
    %4 = vector.load %arg3[%c0_2, %c0_3] : memref<8x256xbf16, #tpu.memory_space<vmem>>, vector<8x256xbf16>
    %c0_4 = arith.constant 0 : index
    %c0_5 = arith.constant 0 : index
    %5 = vector.load %arg4[%c0_4, %c0_5] : memref<256x128xbf16, #tpu.memory_space<vmem>>, vector<256x128xbf16>
    %cst = arith.constant dense<0.000000e+00> : vector<8x128xf32>
    %6 = tpu.matmul %4, %5, %cst {dimension_numbers = #tpu.dot_dimension_numbers<[1], [0], [0], [1], [0, 0, 1, 1], [], []>} : vector<8x256xbf16>, vector<256x128xbf16>, vector<8x128xf32> -> vector<8x128xf32>
    %7 = arith.addf %3, %6 : vector<8x128xf32>
    %c0_6 = arith.constant 0 : index
    %c0_7 = arith.constant 0 : index
    %8 = vector.load %arg6[%c0_6, %c0_7] : memref<8x128xf32, #tpu.memory_space<vmem>>, vector<8x128xf32>
    tpu.vector_store %arg6[%c0_6, %c0_7], %7 {strides = array<i32>} : memref<8x128xf32, #tpu.memory_space<vmem>>, vector<8x128xf32>,
    %c0_i32_8 = arith.constant 0 : i32
    %9 = arith.cmpi eq, %arg2, %c0_i32_8 : i32
    %10 = arith.extui %9 : i1 to i32
    %c0_i32_9 = arith.constant 0 : i32
    %11 = arith.cmpi ne, %10, %c0_i32_9 : i32
    scf.if %11 {
      %c0_10 = arith.constant 0 : index
      %c0_11 = arith.constant 0 : index
      %12 = vector.load %arg6[%c0_10, %c0_11] : memref<8x128xf32, #tpu.memory_space<vmem>>, vector<8x128xf32>
      %13 = arith.truncf %12 : vector<8x128xf32> to vector<8x128xbf16>
      %c0_12 = arith.constant 0 : index
      %c0_13 = arith.constant 0 : index
      %14 = vector.load %arg5[%c0_12, %c0_13] : memref<8x128xbf16, #tpu.memory_space<vmem>>, vector<8x128xbf16>
      tpu.vector_store %arg5[%c0_12, %c0_13], %13 {strides = array<i32>} : memref<8x128xbf16, #tpu.memory_space<vmem>>, vector<8x128xbf16>,
    } else {
    }
    return
  }
  func.func @transform_0(%arg0: i32, %arg1: i32, %arg2: i32) -> (i32, i32) {
    %c0_i32 = arith.constant 0 : i32
    return %arg0, %arg2 : i32, i32
  }
  func.func @transform_1(%arg0: i32, %arg1: i32, %arg2: i32) -> (i32, i32) {
    %c0_i32 = arith.constant 0 : i32
    return %arg2, %arg1 : i32, i32
  }
  func.func @transform_2(%arg0: i32, %arg1: i32, %arg2: i32) -> (i32, i32) {
    %c0_i32 = arith.constant 0 : i32
    return %arg0, %arg1 : i32, i32
  }
}

</mosaic_0001>

<bundles_post_ra>
// kernel: tpu_custom_call.1
= control target key start
LH: loop header
LB: loop body
LE: loop exit
PB: predicated region body
PF: predicated region fallthrough
CT: control target
= control target key end

     0   :  { %7 = vsyncpa [#allocation4], 0  ;;  %s443_s0 = inlined_call_operand.hbm [shape: bf16[8,256], index: 0, kind: input, shape index: {}]   ;;  %s444_s1 = inlined_call_operand.hbm [shape: bf16[256,128], index: 1, kind: input, shape index: {}]   ;;  %s445_s2 = inlined_call_operand.hbm [shape: bf16[8,128], index: 2, kind: output, shape index: {}]  }
   0x1   :  { %8 = vsyncpa [#allocation7], 0 }
   0x2   :  { %9 = vsyncpa [#allocation5], 0  ;;  %s380_s9 = smov [#allocation3]   ;;  %s381_s11 = smov [#allocation6]  }
   0x3   :  { %s16_s10 = sshll.u32 %s380_s9, 4  ;;  %s25_s12 = sshll.u32 %s381_s11, 4  ;;  %s17_s10 = int_to_ptr.vmem [resolvable:$true] %s16_s10  ;;  %s400_s12 = int_to_ptr.vmem [resolvable:$true] %s25_s12 }
   0x4   :  { %s308_s15 = scalar_lea.hbm %s443_s0, 128 }
   0x5   :  { %p309_p0 = scmp.ne.s32.totalorder %s443_s0, %s308_s15  ;;  %p312_p1 = scmp.lt.u32.totalorder %s308_s15, %s443_s0 }
   0x7   :  { %p314_p2 = pnand %p312_p1, %p309_p0 }
   0x9   :  { %317 = shalt.err (!%p314_p2)
}
   0xa   :  { %s318_s20 = scalar_lea.vmem %s17_s10, 128  ;;  %p323_p4 = scmp.lt.s32.totalorder %s17_s10, %s17_s10 }
   0xb   :  { %p319_p3 = scmp.ne.s32.totalorder %s17_s10, %s318_s20  ;;  %p324_p5 = scmp.lt.s32.totalorder %s318_s20, %s318_s20 }
   0xd   :  { %p325_p6 = por %p324_p5, %p323_p4 }
   0xf   :  { %p326_p7 = pnand %p325_p6, %p319_p3 }
  0x11   :  { %329 = shalt.err (!%p326_p7)
}
  0x12   :  { %19 = dma.hbm_to_vmem [thread:$0]  %s443_s0, 128, %s17_s10, [#allocation4]  }
  0x13   :  { %s330_s25 = scalar_lea.hbm %s444_s1, 2048 }
  0x14   :  { %p331_p8 = scmp.ne.s32.totalorder %s444_s1, %s330_s25  ;;  %p334_p9 = scmp.lt.u32.totalorder %s330_s25, %s444_s1 }
  0x16   :  { %p336_p10 = pnand %p334_p9, %p331_p8 }
  0x18   :  { %339 = shalt.err (!%p336_p10)
}
  0x19   :  { %s340_s30 = scalar_lea.vmem %s400_s12, 2048  ;;  %p345_p12 = scmp.lt.s32.totalorder %s400_s12, %s400_s12 }
  0x1a   :  { %p341_p11 = scmp.ne.s32.totalorder %s400_s12, %s340_s30  ;;  %p346_p13 = scmp.lt.s32.totalorder %s340_s30, %s340_s30 }
  0x1c   :  { %p347_p0 = por %p346_p13, %p345_p12 }
  0x1e   :  { %p348_p1 = pnand %p347_p0, %p341_p11 }
  0x20   :  { %351 = shalt.err (!%p348_p1)
}
  0x21   :  { %s382_s0 = smov 64   ;;  %s383_s3 = smov 4  }
  0x22   :  { %31 = dma.hbm_to_vmem [thread:$0]  %s444_s1, 2048, %s400_s12, [#allocation7], %s382_s0, %s382_s0, %s383_s3  }
  0x23   :  { %374 = dma.done.wait [#allocation4], 128  }
  0x24   :  { %375 = vsyncadd [#allocation4], 4294967168 }
  0x25   :  { %376 = dma.done.wait [#allocation7], 2048  }
  0x26   :  { %377 = vsyncadd [#allocation7], 4294965248  ;;  %v290_v0 = vld [vmem:[#allocation6 + $0x40] sm:$0xff]   ;;  %v292_v2 = vld [vmem:[#allocation6 + $0x48] sm:$0xff]   ;;  %s384_s1 = smov [#allocation8]  }
  0x27   :  { %v291_v1 = vld [vmem:[#allocation6] sm:$0xff]   ;;  %263 = vmatprep.subr.bf16.mxu0 %v290_v0  ;;  %v293_v3 = vld [vmem:[#allocation6 + $0x8] sm:$0xff]   ;;  %v294_v4 = vld [vmem:[#allocation6 + $0x50] sm:$0xff]   ;;  %s235_s6 = sshll.u32 %s384_s1, 4  ;;  %s236_s6 = int_to_ptr.vmem [resolvable:$true] %s235_s6 }
  0x28   :  { %264 = vmatpush3.bf16.msra.mxu0 %v291_v1  ;;  %v295_v5 = vld [vmem:[#allocation6 + $0x10] sm:$0xff]   ;;  %v296_v6 = vld [vmem:[#allocation6 + $0x58] sm:$0xff]   ;;  %v298_v8 = vld [vmem:[#allocation6 + $0x60] sm:$0xff]   ;;  %s352_s7 = scalar_lea.vmem %s236_s6, 64  ;;  %p357_p3 = scmp.lt.s32.totalorder %s236_s6, %s236_s6 }
  0x29   :  { %265 = vmatprep.subr.bf16.mxu0 %v292_v2  ;;  %v297_v7 = vld [vmem:[#allocation6 + $0x18] sm:$0xff]   ;;  %v299_v9 = vld [vmem:[#allocation6 + $0x20] sm:$0xff]   ;;  %v300_v10 = vld [vmem:[#allocation6 + $0x68] sm:$0xff]   ;;  %p353_p2 = scmp.ne.s32.totalorder %s236_s6, %s352_s7  ;;  %p358_p4 = scmp.lt.s32.totalorder %s352_s7, %s352_s7 }
  0x2a   :  { %v45_v11 = vld [vmem:[#allocation3] sm:$0xff]  ;;  %v301_v13 = vld [vmem:[#allocation6 + $0x28] sm:$0xff]   ;;  %v302_v14 = vld [vmem:[#allocation6 + $0x70] sm:$0xff]  }
  0x2b   :  { %v246_v12 = vcombine.high %v45_v11, %v45_v11  ;;  %v303_v15 = vld [vmem:[#allocation6 + $0x30] sm:$0xff]   ;;  %v304_v16 = vld [vmem:[#allocation6 + $0x78] sm:$0xff]   ;;  %v245_v18 = vcombine.low %v45_v11, %v45_v11  ;;  %p359_p5 = por %p358_p4, %p357_p3 }
  0x2c   :  { %266 = vmatpush3.bf16.msra.mxu0 %v293_v3  ;;  %v305_v17 = vld [vmem:[#allocation6 + $0x38] sm:$0xff]  }
  0x2d   :  { %267 = vmatprep.subr.bf16.mxu0 %v294_v4  ;;  %213 = vmatprep.mubr.bf16.mxu0 %v246_v12  ;;  %p360_p6 = pnand %p359_p5, %p353_p2 }
  0x30   :  { %268 = vmatpush3.bf16.msra.mxu0 %v295_v5 }
  0x31   :  { %269 = vmatprep.subr.bf16.mxu0 %v296_v6 }
  0x34   :  { %270 = vmatpush3.bf16.msra.mxu0 %v297_v7 }
  0x35   :  { %271 = vmatprep.subr.bf16.mxu0 %v298_v8 }
  0x38   :  { %272 = vmatpush3.bf16.msra.mxu0 %v299_v9 }
  0x39   :  { %273 = vmatprep.subr.bf16.mxu0 %v300_v10 }
  0x3c   :  { %274 = vmatpush3.bf16.msra.mxu0 %v301_v13 }
  0x3d   :  { %275 = vmatprep.subr.bf16.mxu0 %v302_v14 }
  0x40   :  { %276 = vmatpush3.bf16.msra.mxu0 %v303_v15 }
  0x41   :  { %277 = vmatprep.subr.bf16.mxu0 %v304_v16 }
  0x44   :  { %278 = vmatpush3.bf16.msra.mxu0 %v305_v17 }
  0x47   :  { %214 = vmatmul.mubr.bf16.vlgmr.msra.gmra.mrb[0].mxu0 %v245_v18 }
 0x11a   :  { %v279_v19 = vpop.f32.mrb[0].mxu0 }
 0x11b   :  { %v280_v20 = vpop.f32.mrb[1].mxu0 }
 0x11c   :  { %v281_v21 = vadd.f32 %v280_v20, %v279_v19  ;;  %v282_v22 = vpop.f32.mrb[2].mxu0 }
 0x11d   :  { %v283_v23 = vpop.f32.mrb[3].mxu0 }
 0x11e   :  { %v227_v24 = vpack.c.bf16 %v281_v21, %v281_v21 }
 0x120   :  { %228 = vst [vmem:[#allocation8] sm:$0xf] %v227_v24 }
 0x121   :  { %363 = shalt.err (!%p360_p6)
}
 0x122   :  { %s364_s10 = scalar_lea.hbm %s445_s2, 64 }
 0x123   :  { %p365_p7 = scmp.ne.s32.totalorder %s445_s2, %s364_s10  ;;  %p368_p8 = scmp.lt.u32.totalorder %s364_s10, %s445_s2 }
 0x125   :  { %p370_p9 = pnand %p368_p8, %p365_p7 }
 0x127   :  { %373 = shalt.err (!%p370_p9)
}
 0x128   :  { %238 = dma.vmem_to_hbm [thread:$0]  %s236_s6, 64, %s445_s2, [#allocation5]  }
 0x129   :  { %378 = dma.done.wait [#allocation5], 64  }
 0x12a   :  { %379 = vsyncadd [#allocation5], 4294967232 }
 0x12b   :  { %242 = vsyncpa [#allocation4], 1 }
 0x12c   :  { %243 = vsyncpa [#allocation7], 1 }
 0x12d   :  { %244 = vsyncpa [#allocation5], 1 }

</bundles_post_ra>
